<compile_context>
chip_gen: v6e
topology: v6e:2x2x1
jax: 0.10.0
libtpu: 0.0.40
codegen_flags: <defaults>
</compile_context>

<pallas_src>
import jax
import jax.numpy as jnp
from jax.experimental import pallas as pl
from jax.experimental.pallas import tpu as pltpu


def _round_up(n, m):
    return ((n + m - 1) // m) * m


def mlp_kernel(x_ref, w_ref, b_ref, o_ref):
    # x_ref: (TB, D_in) natural-layout tile of x
    # w_ref: (D_in, 1)  fused weight column (VMEM-resident across grid steps)
    # b_ref: (1,)       fused scalar bias in SMEM
    # o_ref: (TB, 1)    output tile
    y = jnp.dot(x_ref[...], w_ref[...], preferred_element_type=jnp.float32)
    o_ref[...] = (y + b_ref[0]).astype(o_ref.dtype)


def _choose_tile(B, D_in, itemsize, *, x_vmem_budget=16 * 1024 * 1024, min_tiles=4):
    # Tile large enough (multi-MiB) that per-grid-step overhead (~0.35us) is
    # negligible vs the tile's HBM drain time, small enough that the
    # double-buffered x tile fits a budget that is safe on v7x's 64 MiB VMEM,
    # and (for large B) at least `min_tiles` tiles so v7x's two TensorCores
    # both get work.
    tb_budget = max(128, (x_vmem_budget // (2 * itemsize * D_in)) // 128 * 128)
    tb_split = max(128, _round_up(pl.cdiv(B, min_tiles), 128))
    return min(tb_budget, tb_split, _round_up(B, 8))


@jax.jit
def mlp_forward(x, w1, b1, w2, b2):
    """Forward of MLP: (x @ w1 + b1) @ w2 + b2.

    Weights are in (in, out) layout (transpose of PyTorch nn.Linear.weight);
    b1 is (1, H), b2 is (1, 1).  There is no activation between the layers,
    so the two affine maps are fused exactly in the wrapper.
    """
    B, D_in = x.shape
    itemsize = x.dtype.itemsize

    # Exact algebraic fusion (valid only because there is no nonlinearity /
    # dropout between the two Linears).  Accumulate in f32.
    w = jnp.dot(w1, w2, preferred_element_type=jnp.float32).astype(x.dtype)   # (D_in, 1)
    b = (jnp.dot(b1, w2, preferred_element_type=jnp.float32)
         + b2.astype(jnp.float32)).reshape((1,))                              # (1,) scalar

    tb = _choose_tile(B, D_in, itemsize)
    grid = (pl.cdiv(B, tb),)   # Pallas masks the ragged last tile (rows independent)

    # Pipeline VMEM footprint: 2x-buffered x tile + 2x-buffered out tile +
    # resident fused weight + headroom.  Well under v7x's 64 MiB/TC and raised
    # above v5e's 16 MiB scoped default when tiles are large.
    vmem_limit = int(2 * tb * D_in * itemsize          # x double buffer
                     + 2 * tb * itemsize               # out double buffer
                     + 2 * D_in * itemsize             # fused weight
                     + (4 << 20))                      # headroom

    return pl.pallas_call(
        mlp_kernel,
        out_shape=jax.ShapeDtypeStruct((B, 1), x.dtype),
        grid_spec=pltpu.PrefetchScalarGridSpec(
            num_scalar_prefetch=0,
            grid=grid,
            in_specs=[
                pl.BlockSpec((tb, D_in), lambda i: (i, 0)),          # x, natural layout
                pl.BlockSpec((D_in, 1), lambda i: (0, 0)),           # fused W (resident)
                pl.BlockSpec(memory_space=pltpu.MemorySpace.SMEM),   # scalar bias
            ],
            out_specs=pl.BlockSpec((tb, 1), lambda i: (i, 0)),
        ),
        compiler_params=pltpu.CompilerParams(
            dimension_semantics=("parallel",),   # v7x: shard batch tiles over 2 TCs
            vmem_limit_bytes=vmem_limit,
        ),
        cost_estimate=pl.CostEstimate(
            flops=2 * B * D_in,
            transcendentals=0,
            bytes_accessed=B * D_in * itemsize + B * itemsize + D_in * itemsize,
        ),
    )(x, w, b)


if __name__ == "__main__":
    key = jax.random.PRNGKey(0)
    k_x, k_w1, k_b1, k_w2, k_b2, k_x2 = jax.random.split(key, 6)

    batch = 8
    input_dim = 32
    hidden_dim = 64   # fixed by the module
    out_dim = 1

    # Deterministic synthetic params in (in, out) layout
    # (= transpose of PyTorch nn.Linear's (out, in) weight).
    w1 = jax.random.normal(k_w1, (input_dim, hidden_dim), dtype=jnp.float32) * 0.1
    b1 = jax.random.normal(k_b1, (1, hidden_dim), dtype=jnp.float32) * 0.1
    w2 = jax.random.normal(k_w2, (hidden_dim, out_dim), dtype=jnp.float32) * 0.1
    b2 = jax.random.normal(k_b2, (1, out_dim), dtype=jnp.float32) * 0.1

    def ref(xin):
        return (xin @ w1 + b1) @ w2 + b2   # unfused two-layer reference

    # TODO(synk): set_sub_network / reset_super_network are training-time
    # configuration hooks (sub-network slicing), not part of the forward pass.

    # Small-shape check (single grid step, tile == batch).
    x = jax.random.normal(k_x, (batch, input_dim), dtype=jnp.float32)
    y = jax.block_until_ready(mlp_forward(x, w1, b1, w2, b2))
    assert y.shape == (batch, out_dim)
    assert jnp.allclose(y, ref(x), atol=1e-4, rtol=1e-4)

    # Larger batch exercises the multi-tile grid + Pallas-masked ragged tail
    # (1000 -> 4 tiles of 256, last tile partial).
    x2 = jax.random.normal(k_x2, (1000, input_dim), dtype=jnp.float32)
    y2 = jax.block_until_ready(mlp_forward(x2, w1, b1, w2, b2))
    assert y2.shape == (1000, out_dim)
    assert jnp.allclose(y2, ref(x2), atol=1e-4, rtol=1e-4)

    print("KERNEL_OK")
</pallas_src>

<mosaic_0001>
module attributes {stable_mosaic.version = 11 : i64} {
  func.func @mlp_kernel(%arg0: i32, %arg1: memref<8x32xf32, #tpu.memory_space<vmem>>, %arg2: memref<32x1xf32, #tpu.memory_space<vmem>>, %arg3: memref<1xf32, #tpu.memory_space<smem>>, %arg4: memref<8x1xf32, #tpu.memory_space<vmem>>) attributes {dimension_semantics = [#tpu.dimension_semantics<parallel>], iteration_bounds = array<i64: 1>, scalar_prefetch = 0 : i64, scratch_operands = 0 : i64, tpu.core_type = #tpu.core_type<tc>, window_params = [{transform_indices = @transform_0, window_bounds = array<i64: 8, 32>}, {pipeline_mode = #tpu.pipeline_mode<synchronous>, transform_indices = @transform_1, window_bounds = array<i64: 32, 1>}, {transform_indices = @transform_2, window_bounds = array<i64: 1>}, {transform_indices = @transform_3, window_bounds = array<i64: 8, 1>}]} {
    %c0 = arith.constant 0 : index
    %c0_0 = arith.constant 0 : index
    %0 = vector.load %arg1[%c0, %c0_0] : memref<8x32xf32, #tpu.memory_space<vmem>>, vector<8x32xf32>
    %c0_1 = arith.constant 0 : index
    %c0_2 = arith.constant 0 : index
    %1 = vector.load %arg2[%c0_1, %c0_2] : memref<32x1xf32, #tpu.memory_space<vmem>>, vector<32x1xf32>
    %cst = arith.constant dense<0.000000e+00> : vector<8x1xf32>
    %2 = tpu.matmul %0, %1, %cst {dimension_numbers = #tpu.dot_dimension_numbers<[1], [0], [0], [1], [0, 0, 1, 1], [], []>} : vector<8x32xf32>, vector<32x1xf32>, vector<8x1xf32> -> vector<8x1xf32>
    %c0_3 = arith.constant 0 : index
    %3 = memref.load %arg3[%c0_3] : memref<1xf32, #tpu.memory_space<smem>>
    %4 = vector.broadcast %3 : f32 to vector<8x1xf32>
    %5 = arith.addf %2, %4 : vector<8x1xf32>
    %c0_4 = arith.constant 0 : index
    %c0_5 = arith.constant 0 : index
    %6 = vector.load %arg4[%c0_4, %c0_5] : memref<8x1xf32, #tpu.memory_space<vmem>>, vector<8x1xf32>
    tpu.vector_store %arg4[%c0_4, %c0_5], %5 {strides = array<i32>} : memref<8x1xf32, #tpu.memory_space<vmem>>, vector<8x1xf32>,
    return
  }
  func.func @transform_0(%arg0: i32) -> (i32, i32) {
    %c0_i32 = arith.constant 0 : i32
    %c0_i32_0 = arith.constant 0 : i32
    return %arg0, %c0_i32 : i32, i32
  }
  func.func @transform_1(%arg0: i32) -> (i32, i32) {
    %c0_i32 = arith.constant 0 : i32
    %c0_i32_0 = arith.constant 0 : i32
    %c0_i32_1 = arith.constant 0 : i32
    return %c0_i32, %c0_i32_0 : i32, i32
  }
  func.func @transform_2(%arg0: i32) -> i32 {
    %c0_i32 = arith.constant 0 : i32
    %c0_i32_0 = arith.constant 0 : i32
    return %c0_i32 : i32
  }
  func.func @transform_3(%arg0: i32) -> (i32, i32) {
    %c0_i32 = arith.constant 0 : i32
    %c0_i32_0 = arith.constant 0 : i32
    return %arg0, %c0_i32 : i32, i32
  }
}

</mosaic_0001>

<bundles_post_ra>
// kernel: mlp_forward.1
= control target key start
LH: loop header
LB: loop body
LE: loop exit
PB: predicated region body
PF: predicated region fallthrough
CT: control target
= control target key end

     0   :  { %v121_v0 = vmov 0.0   ;;  %vm122_vm0 = vmmov 0   ;;  %vm22_vm1 = vcmask 261120   ;;  %vm96_vm2 = vcmask 7168   ;;  %s164_s1 = inlined_call_operand.vmem [shape: f32[32,1], index: 1, kind: input, shape index: {}]   ;;  %s165_s0 = inlined_call_operand.vmem [shape: f32[8,32], index: 0, kind: input, shape index: {}]   ;;  %s166_s2 = inlined_call_operand.<no memory space> [shape: f32[1], index: 2, kind: input, shape index: {}]   ;;  %s167_s3 = inlined_call_operand.vmem [shape: f32[8,1], index: 3, kind: output, shape index: {}]  }
   0x1   :  { %108 = vmatprep.subr.mxu0 %v121_v0  ;;  %v19_v1 = vld [vmem:[%s164_s1 + $0x18] sm:$0xff]  ;;  %v18_v2 = vld [vmem:[%s164_s1 + $0x10] sm:$0xff]  ;;  %116 = vmatprep.mubr.msk.f32.mxu0 %vm122_vm0, %v121_v0  ;;  %v17_v3 = vld [vmem:[%s164_s1 + $0x8] sm:$0xff]  ;;  %v21_v6 = vstv %s166_s2 }
   0x2   :  { %109 = vmatpush3.msra.mxu0 %v19_v1  ;;  %v16_v4 = vld [vmem:[%s164_s1] sm:$0xff] }
   0x3   :  { %110 = vmatprep.subr.mxu0 %v121_v0  ;;  %v15_v5 = vld [vmem:[%s165_s0] sm:$0xff] }
   0x4   :  { %111 = vmatpush3.msra.mxu0 %v18_v2 }
   0x5   :  { %112 = vmatprep.subr.mxu0 %v121_v0 }
   0x6   :  { %113 = vmatpush3.msra.mxu0 %v17_v3 }
   0x7   :  { %114 = vmatprep.subr.mxu0 %v121_v0 }
   0x8   :  { %115 = vmatpush3.msra.mxu0 %v16_v4 }
   0x9   :  { %117 = vmatmul.mubr.msk.f32.vlgmr.msra.gmra.mxu0 %vm22_vm1, %v15_v5 }
  0xc9   :  { %v92_v7 = vpop.f32.mrf.mxu0 }
  0xca   :  { %v93_v8 = vadd.f32 %v92_v7, %v21_v6 }
  0xcb   :  { %v118_v9 = vpop.f32.mrf.mxu0 }
  0xcc   :  { %97 = vst.msk [vmem:[%s167_s3] sm:$0xff] %vm96_vm2, %v93_v8 }

</bundles_post_ra>
